<compile_context>
chip_gen: v7x
topology: tpu7x:2x2x1
jax: 0.10.0
libtpu: 0.0.40
codegen_flags: <defaults>
</compile_context>

<pallas_src>
import jax
import jax.numpy as jnp
from jax.experimental import pallas as pl
from jax.experimental.pallas import tpu as pltpu

LANE = 128  # TPU lane width; feature dims padded to a multiple of this.
VMEM_LIMIT_BYTES = 32 * 1024 * 1024   # explicit; safe on v7x's 64 MiB physical
VMEM_TILE_BUDGET = 24 * 1024 * 1024   # headroom below the scoped limit


def _round_up(x: int, m: int) -> int:
    return ((x + m - 1) // m) * m


def _next_pow2(x: int) -> int:
    return 1 if x <= 1 else 1 << (x - 1).bit_length()


def _fused_linear_kernel(tile_type_ref, x_ref, wt_ref, o_ref):
    # tile_type_ref (SMEM scalar prefetch) is only consumed by the index_maps.
    del tile_type_ref
    # Hot path: one MXU matmul per (tile_m, d_in_pad) x (d_in_pad, d_out_pad)
    # tile; bf16 operands, f32 accumulation, lane-dense store in o_ref.dtype
    # (bf16 by default -> halves the dominant HBM write stream).
    o_ref[...] = jnp.dot(
        x_ref[...], wt_ref[...], preferred_element_type=jnp.float32
    ).astype(o_ref.dtype)


def init_unify_size_params(input_dim: dict, output_dim: int, key) -> dict:
    """PyTorch-like nn.Linear weights: (output_dim, input_dim_k), f32."""
    params = {}
    for k in sorted(input_dim):
        key, sub = jax.random.split(key)
        d_in = input_dim[k]
        bound = 1.0 / (d_in ** 0.5)  # mimic PyTorch default uniform init range
        params[k] = jax.random.uniform(
            sub, (output_dim, d_in), dtype=jnp.float32, minval=-bound, maxval=bound
        )
    return params


def pack_unify_size_params(input_dim: dict, output_dim: int, weights: dict) -> dict:
    """One-time packing: transpose, zero-pad to 128-multiple dims, stack, bf16."""
    keys = list(weights.keys())
    d_in_pad = _round_up(max(input_dim[k] for k in keys), LANE)
    d_out_pad = _round_up(output_dim, LANE)
    w_stack = jnp.zeros((len(keys), d_in_pad, d_out_pad), dtype=jnp.bfloat16)
    for i, k in enumerate(keys):
        wt = weights[k].T.astype(jnp.bfloat16)  # (d_in_k, d_out)
        w_stack = w_stack.at[i, : wt.shape[0], : wt.shape[1]].set(wt)
    return {
        "keys": keys,
        "key_to_idx": {k: i for i, k in enumerate(keys)},
        "w_stack": w_stack,  # (num_types, d_in_pad, d_out_pad), zero-padded bf16
        "d_in_pad": d_in_pad,
        "d_out_pad": d_out_pad,
        "output_dim": output_dim,
    }


def _select_tile_m(max_rows: int, d_in_pad: int, d_out_pad: int,
                   out_itemsize: int, tile_m: int) -> int:
    # Multiple of 128: bf16-native (16,128) tiling and MXU M-pass granularity.
    tile_m = min(tile_m, _round_up(max(max_rows, 1), LANE))
    tile_m = max(LANE, _round_up(tile_m, LANE))

    # Double-buffered per-step working set (x tile + out tile + weight slab).
    def working_set(tm):
        return 2 * (tm * d_in_pad * 2
                    + tm * d_out_pad * out_itemsize
                    + d_in_pad * d_out_pad * 2)

    while working_set(tile_m) > VMEM_TILE_BUDGET and tile_m > LANE:
        tile_m = max(LANE, (tile_m // 2) // LANE * LANE)
    return tile_m


def pack_unify_size_inputs(feats: dict, packed: dict, *, tile_m: int = 2048,
                           out_dtype=jnp.bfloat16) -> dict:
    """Marshal per-type features into one fused, tile-aligned bf16 matrix.

    Do this ONCE per graph and reuse across calls where possible: it is an
    extra read+write pass over the activations.  Rows stay grouped by node
    type so the weight slab only swaps at type boundaries.
    """
    d_in_pad = packed["d_in_pad"]
    d_out_pad = packed["d_out_pad"]
    out_itemsize = jnp.dtype(out_dtype).itemsize

    max_rows = max(x.shape[0] for x in feats.values())
    tile_m = _select_tile_m(max_rows, d_in_pad, d_out_pad, out_itemsize, tile_m)

    x_blocks = []
    tile_types = []
    row_spans = []  # (key, row_offset_in_fused_array, n_rows)
    offset = 0
    for k, x in feats.items():
        n, d = x.shape
        # Bucket per-type tile count to a power of two so varying graph sizes
        # reuse the same compiled kernel instead of retracing.
        n_tiles = _next_pow2(pl.cdiv(max(n, 1), tile_m))
        n_pad = n_tiles * tile_m
        xp = jnp.zeros((n_pad, d_in_pad), dtype=jnp.bfloat16)
        xp = xp.at[:n, :d].set(x.astype(jnp.bfloat16))
        x_blocks.append(xp)
        tile_types += [packed["key_to_idx"][k]] * n_tiles
        row_spans.append((k, offset, n))
        offset += n_pad

    return {
        "x_all": jnp.concatenate(x_blocks, axis=0),     # (rows_pad, d_in_pad) bf16
        "tile_type_ids": jnp.asarray(tile_types, dtype=jnp.int32),
        "row_spans": row_spans,
        "tile_m": tile_m,
        "out_dtype": out_dtype,
    }


def unify_size_forward(feats_or_packed_inputs, packed: dict, *,
                       tile_m: int = 2048, out_dtype=jnp.bfloat16,
                       return_fused: bool = False):
    """Fused Pallas equivalent of UnifySize.forward.

    Accepts either a raw feats dict or the result of pack_unify_size_inputs().
    """
    d_in_pad = packed["d_in_pad"]
    d_out_pad = packed["d_out_pad"]
    d_out = packed["output_dim"]

    if isinstance(feats_or_packed_inputs, dict) and "x_all" in feats_or_packed_inputs:
        pin = feats_or_packed_inputs
    else:
        pin = pack_unify_size_inputs(
            feats_or_packed_inputs, packed, tile_m=tile_m, out_dtype=out_dtype
        )

    x_all = pin["x_all"]
    tile_type_ids = pin["tile_type_ids"]
    row_spans = pin["row_spans"]
    tile_m = pin["tile_m"]
    out_dtype = pin["out_dtype"]
    num_tiles = x_all.shape[0] // tile_m

    out = pl.pallas_call(
        _fused_linear_kernel,
        out_shape=jax.ShapeDtypeStruct((x_all.shape[0], d_out_pad), out_dtype),
        grid_spec=pltpu.PrefetchScalarGridSpec(
            num_scalar_prefetch=1,
            grid=(num_tiles,),
            in_specs=[
                # Row tiles of the fused feature matrix.
                pl.BlockSpec((tile_m, d_in_pad), lambda i, tid: (i, 0)),
                # Per-tile weight slab selected by the prefetched type table;
                # leading dim squeezed so the kernel sees (d_in_pad, d_out_pad).
                # tid is grouped by type -> slab index only changes at type
                # boundaries, so consecutive same-type tiles skip the re-DMA.
                pl.BlockSpec(
                    (None, d_in_pad, d_out_pad), lambda i, tid: (tid[i], 0, 0)
                ),
            ],
            out_specs=pl.BlockSpec((tile_m, d_out_pad), lambda i, tid: (i, 0)),
        ),
        compiler_params=pltpu.CompilerParams(
            dimension_semantics=("parallel",),  # shard row tiles across v7x's 2 TCs
            vmem_limit_bytes=VMEM_LIMIT_BYTES,
        ),
    )(tile_type_ids, x_all, packed["w_stack"])

    if return_fused:
        # Fused, padded output + spans: lets the consumer fuse the slicing and
        # avoids an extra pass over 128-lane-padded data here.
        return out, row_spans

    # Slice real rows / real output_dim columns back out per node type.
    return {k: out[off: off + n, :d_out] for (k, off, n) in row_spans}


if __name__ == "__main__":
    key = jax.random.PRNGKey(0)

    # Heterogeneous input feature sizes per node type, unified to output_dim.
    input_dim = {"atom": 16, "bond": 32, "global": 8}
    output_dim = 32
    num_nodes = {"atom": 8, "bond": 16, "global": 2}

    params = init_unify_size_params(input_dim, output_dim, key)
    packed = pack_unify_size_params(input_dim, output_dim, params)

    feats = {}
    for k in sorted(input_dim):
        key, sub = jax.random.split(key)
        feats[k] = jax.random.normal(
            sub, (num_nodes[k], input_dim[k]), dtype=jnp.float32
        )

    # Marshal once (reusable across calls), then run the fused kernel.
    packed_inputs = pack_unify_size_inputs(feats, packed)
    out = unify_size_forward(packed_inputs, packed)
    out = jax.block_until_ready(out)

    # Check against references.
    for k, x in feats.items():
        assert out[k].shape == (num_nodes[k], output_dim)
        assert out[k].dtype == jnp.bfloat16
        y = out[k].astype(jnp.float32)
        # bf16-operand / f32-accumulate reference (matches kernel arithmetic up
        # to the final bf16 store).
        ref_bf16 = jnp.dot(
            x.astype(jnp.bfloat16),
            params[k].T.astype(jnp.bfloat16),
            preferred_element_type=jnp.float32,
        )
        assert jnp.allclose(y, ref_bf16, atol=3e-2, rtol=3e-2)
        # f32 reference, loose tolerance for bf16 input/output rounding.
        ref_f32 = x @ params[k].T
        assert jnp.allclose(y, ref_f32, atol=6e-2, rtol=6e-2)

    # Also exercise the fused-output path (no post-kernel slicing pass).
    fused, spans = unify_size_forward(packed_inputs, packed, return_fused=True)
    fused = jax.block_until_ready(fused)
    for (k, off, n) in spans:
        ref_f32 = feats[k] @ params[k].T
        assert jnp.allclose(
            fused[off: off + n, :output_dim].astype(jnp.float32),
            ref_f32, atol=6e-2, rtol=6e-2,
        )

    print("KERNEL_OK")
</pallas_src>

<mosaic_0001>
module attributes {stable_mosaic.version = 11 : i64} {
  func.func @_fused_linear_kernel(%arg0: i32, %arg1: memref<3xi32, #tpu.memory_space<smem>>, %arg2: memref<128x128xbf16, #tpu.memory_space<vmem>>, %arg3: memref<1x128x128xbf16, #tpu.memory_space<vmem>>, %arg4: memref<128x128xbf16, #tpu.memory_space<vmem>>) attributes {dimension_semantics = [#tpu.dimension_semantics<parallel>], iteration_bounds = array<i64: 3>, scalar_prefetch = 1 : i64, scratch_operands = 0 : i64, tpu.core_type = #tpu.core_type<tc>, window_params = [{transform_indices = @transform_0, window_bounds = array<i64: 128, 128>}, {transform_indices = @transform_1, window_bounds = array<i64: 1, 128, 128>}, {transform_indices = @transform_2, window_bounds = array<i64: 128, 128>}]} {
    %c0 = arith.constant 0 : index
    %c0_0 = arith.constant 0 : index
    %0 = vector.load %arg2[%c0, %c0_0] : memref<128x128xbf16, #tpu.memory_space<vmem>>, vector<128x128xbf16>
    %c0_1 = arith.constant 0 : index
    %c0_2 = arith.constant 0 : index
    %c0_3 = arith.constant 0 : index
    %1 = vector.load %arg3[%c0_1, %c0_2, %c0_3] : memref<1x128x128xbf16, #tpu.memory_space<vmem>>, vector<1x128x128xbf16>
    %2 = vector.shape_cast %1 : vector<1x128x128xbf16> to vector<128x128xbf16>
    %cst = arith.constant dense<0.000000e+00> : vector<128x128xf32>
    %3 = tpu.matmul %0, %2, %cst {dimension_numbers = #tpu.dot_dimension_numbers<[1], [0], [0], [1], [0, 0, 1, 1], [], []>} : vector<128x128xbf16>, vector<128x128xbf16>, vector<128x128xf32> -> vector<128x128xf32>
    %4 = arith.truncf %3 : vector<128x128xf32> to vector<128x128xbf16>
    %c0_4 = arith.constant 0 : index
    %c0_5 = arith.constant 0 : index
    %5 = vector.load %arg4[%c0_4, %c0_5] : memref<128x128xbf16, #tpu.memory_space<vmem>>, vector<128x128xbf16>
    tpu.vector_store %arg4[%c0_4, %c0_5], %4 {strides = array<i32>} : memref<128x128xbf16, #tpu.memory_space<vmem>>, vector<128x128xbf16>,
    return
  }
  func.func @transform_0(%arg0: i32, %arg1: memref<3xi32, #tpu.memory_space<smem>>) -> (i32, i32) {
    %c0_i32 = arith.constant 0 : i32
    %c0_i32_0 = arith.constant 0 : i32
    return %arg0, %c0_i32 : i32, i32
  }
  func.func @transform_1(%arg0: i32, %arg1: memref<3xi32, #tpu.memory_space<smem>>) -> (i32, i32, i32) {
    %0 = arith.index_cast %arg0 : i32 to index
    %1 = memref.load %arg1[%0] : memref<3xi32, #tpu.memory_space<smem>>
    %c0_i32 = arith.constant 0 : i32
    %c0_i32_0 = arith.constant 0 : i32
    %c0_i32_1 = arith.constant 0 : i32
    return %1, %c0_i32, %c0_i32_0 : i32, i32, i32
  }
  func.func @transform_2(%arg0: i32, %arg1: memref<3xi32, #tpu.memory_space<smem>>) -> (i32, i32) {
    %c0_i32 = arith.constant 0 : i32
    %c0_i32_0 = arith.constant 0 : i32
    return %arg0, %c0_i32 : i32, i32
  }
}

</mosaic_0001>

<bundles_post_ra>
// kernel: tpu_custom_call.1
= control target key start
LH: loop header
LB: loop body
LE: loop exit
PB: predicated region body
PF: predicated region fallthrough
CT: control target
= control target key end

     0   :  { %s1418_s0 = inlined_call_operand.hbm [shape: s32[3], index: 0, kind: input, shape index: {}]   ;;  %s1419_s1 = inlined_call_operand.hbm [shape: bf16[384,128], index: 1, kind: input, shape index: {}]   ;;  %s1420_s2 = inlined_call_operand.hbm [shape: bf16[3,128,128], index: 2, kind: input, shape index: {}]   ;;  %s1421_s3 = inlined_call_operand.hbm [shape: bf16[384,128], index: 3, kind: output, shape index: {}]  }
   0x1   :  { %1430 = sst [smem:[#allocation16_spill]] %s1419_s1  ;;  %s909_s14 = scalar_lea.hbm %s1418_s0, 16 }
   0x2   :  { %p910_p0 = scmp.ne.s32.totalorder %s1418_s0, %s909_s14  ;;  %p913_p1 = scmp.lt.u32.totalorder %s909_s14, %s1418_s0 }
   0x4   :  { %p915_p2 = pnand %p913_p1, %p910_p0 }
   0x6   :  { %918 = shalt.err (!%p915_p2)  }
   0x7   :  { %s1077_s19 = smov [#allocation3]  }
   0x8   :  { %9 = dma.hbm_to_smem %s1418_s0, 16, %s1077_s19, [#allocation2] }
   0x9   :  { %1035 = dma.done.wait [#allocation2], 16 }
   0xa   :  { %1036 = vsyncadd [#allocation2], 4294967280 }
   0xb   :  { %11 = sfence }
   0xc   :  { %12 = vsyncpa [#allocation5], 0 }
   0xd   :  { %14 = vsyncpa [#allocation5 + $0x1], 0 }
   0xe   :  { %15 = vsyncpa [#allocation8], 0 }
   0xf   :  { %17 = vsyncpa [#allocation8 + $0x1], 0 }
  0x10   :  { %18 = vsyncpa [#allocation6], 0 }
  0x11   :  { %20 = vsyncpa [#allocation6 + $0x1], 0  ;;  %s1117_s22 = smov 0   ;;  %s1119_s23 = smov 0  }
  0x12   :  { %s1121_s24 = smov 0   ;;  %s1123_s25 = smov 0  }
  0x13   :  { %s1125_s26 = smov 0   ;;  %s1127_s0 = smov 0  }
  0x14   :  { %s1129_s27 = smov 0  }
  0x15 LB: > { %s1153_s28 = sadd.s32 4294967295, %s1075_s27   ;;  %s629_s29 = sadd.s32 4294967294, %s1075_s27   ;;  %s1075_s27 = sphi %s1129_s27, %s1458_s27   ;;  %s1071_s0 = sphi %s1127_s0, %s1457_s0   ;;  %s1067_s26 = sphi %s1125_s26, %s1456_s26   ;;  %s1063_s25 = sphi %s1123_s25, %s1455_s25   ;;  %s1059_s24 = sphi %s1121_s24, %s1454_s24   ;;  %s1055_s23 = sphi %s1119_s23, %s1453_s23   ;;  %s1051_s22 = sphi %s1117_s22, %s1452_s22  }
  0x16   : > { %s1157_s30 = sadd.s32 1, %s1075_s27   ;;  %s33_s4 = sadd.s32 1, %s1071_s0 }
  0x17   : > { %s30_s5 = ssub.s32 %s1075_s27, %s1157_s30  ;;  %p40_p3 = scmp.ne.s32.totalorder %s1071_s0, %s1067_s26 }
  0x18   : > { %p31_p4 = scmp.eq.s32.totalorder %s30_s5, 0  ;;  %p1423_p5 = scmp.eq.s32.totalorder %s1075_s27, 0 }
  0x19   : > { %p46_p6 = scmp.ne.s32.totalorder %s1067_s26, %s1063_s25  ;;  %p1424_p7 = scmp.eq.s32.totalorder %s1153_s28, 0 }
  0x1a   : > { %s1169_s6 = scalar_select %p31_p4, %s1071_s0, %s33_s4  }
  0x1b   : > { %p1173_p8 = por %p1423_p5, %p40_p3  ;;  %p1179_p9 = por %p1424_p7, %p46_p6 }
  0x1c   : > { %s1184_s9 = sld [smem:[#allocation3 + %s1157_s30]]  ;;  %p98_p10 = scmp.eq.s32.totalorder %s1153_s28, 2 }
  0x1d   : > { %s1432_s8 = scalar_select %p1179_p9, 1, 0 }
  0x1e   : > { %p104_p11 = scmp.eq.s32.totalorder %s629_s29, 2  ;;  %p1187_p12 = por %p98_p10, %p40_p3 }
  0x1f   : > { %p1422_p13 = scmp.lt.s32.totalorder %s1075_s27, 3  ;;  %s124_s12 = sand.u32 1, %s1071_s0  }
  0x20   : > { %s1433_s10 = scalar_select %p1187_p12, 1, 0 }
  0x21   : > { %p1192_p0 = por %p104_p11, %p46_p6  ;;  %s632_s13 = sshll.u32 %s124_s12, 6 }
  0x22   : > { %s679_s14 = sshll.u32 %s1075_s27, 10  ;;  %s1435_s1 = sld [smem:[#allocation16_spill]] }
  0x23   : > { %s1434_s11 = scalar_select %p1192_p0, 1, 0 }
  0x24   : > { %s128_s18 = scalar_lea.vmem [#allocation4], %s632_s13  ;;  %p1209_p1 = pnand %p1422_p13, %p1173_p8 }
  0x25   : > { %s135_s19 = sshll.u32 %s128_s18, 4  ;;  %s1214_s21 = scalar_lea.sflag [#allocation5], %s124_s12  ;;  %s1203_s19 = int_to_ptr.vmem [resolvable:$true] %s135_s19 }
  0x26   : > { %p921_p4 = pneg %p1209_p1 }
  0x28   : > { %s1201_s17 = scalar_lea.hbm %s1435_s1, %s679_s14  ;;  %s924_s7 = scalar_lea.hbm %s1435_s1, 3072 }
  0x29   : > { %s919_s29 = scalar_lea.hbm %s1201_s17, 1024  ;;  %p925_p8 = scmp.lt.u32.totalorder %s1201_s17, %s1435_s1 }
  0x2a   : > { %p920_p3 = scmp.ne.s32.totalorder %s1201_s17, %s919_s29  ;;  %p926_p11 = scmp.lt.u32.totalorder %s924_s7, %s919_s29 }
  0x2b   : > { %p928_p5 = scmp.lt.u32.totalorder %s919_s29, %s1201_s17 }
  0x2c   : > { %p922_p6 = pnand %p921_p4, %p920_p3  ;;  %p927_p13 = por %p926_p11, %p925_p8 }
  0x2e   : > { %p923_p10 = pneg %p922_p6  ;;  %p929_p7 = por %p928_p5, %p927_p13 }
  0x30   : > { %p930_p2 = pnand %p929_p7, %p923_p10 }
  0x32   : > { %933 = shalt.err (!%p930_p2)
}
  0x33   : > { %s934_s12 = scalar_lea.vmem %s1203_s19, 1024  ;;  %s1078_s15 = smov [#allocation4]  }
  0x34   : > { %p935_p3 = scmp.ne.s32.totalorder %s1203_s19, %s934_s12  ;;  %s939_s16 = sshll.u32 %s1078_s15, 4  ;;  %s940_s16 = int_to_ptr.vmem [resolvable:$false] %s939_s16 }
  0x35   : > { %s941_s18 = scalar_lea.vmem %s940_s16, 2048  ;;  %p942_p12 = scmp.lt.s32.totalorder %s1203_s19, %s940_s16 }
  0x36   : > { %p937_p6 = pnand %p935_p3, %p921_p4  ;;  %p943_p8 = scmp.lt.s32.totalorder %s941_s18, %s934_s12 }
  0x38   : > { %p938_p0 = pneg %p937_p6  ;;  %p944_p11 = por %p943_p8, %p942_p12 }
  0x3a   : > { %p945_p5 = pnand %p944_p11, %p938_p0 }
  0x3c   : > { %948 = shalt.err (!%p945_p5)
}
  0x3d   : > { %s1426_s29 = smov 64   ;;  %s1427_s4 = smov 4  }
  0x3e   : > { %820 = dma.hbm_to_vmem [thread:$0]  (!%p1209_p1), %s1201_s17, 1024, %s1203_s19, %s1214_s21, %s1426_s29, %s1426_s29, %s1427_s4  }
  0x3f   : > { %p165_p7 = scmp.lt.s32.totalorder %s1075_s27, 4  ;;  %p1437_p12 = scmp.ge.s32.totalorder %s1075_s27, 1 }
  0x40   : > { %s56_s7 = sld [smem:[#allocation3 + %s1075_s27]]  ;;  %p68_p0 = scmp.ne.s32.totalorder %s1059_s24, %s1055_s23 }
  0x41   : > { %p1248_p13 = pnand %p1437_p12, %p165_p7  ;;  %p74_p2 = scmp.ne.s32.totalorder %s1055_s23, %s1051_s22 }
  0x42   : > { %p1439_p4 = scmp.eq.s32.totalorder %s1153_s28, 0  ;;  %s145_s13 = sand.u32 1, %s1059_s24  }
  0x43   : > { %p1441_p3 = scmp.eq.s32.totalorder %s1075_s27, 0  ;;  %s61_s17 = sadd.s32 1, %s1059_s24 }
  0x44   : > { %p1259_p10 = por %p74_p2, %p1439_p4  ;;  %s635_s21 = sshll.u32 %s145_s13, 6 }
  0x45   : > { %p70_p1 = por %p68_p0, %p1441_p3  ;;  %p1442_p8 = scmp.lt.s32.totalorder %s1075_s27, 3 }
  0x46   : > { %s1440_s20 = scalar_select %p1259_p10, 1, 0 }
  0x47   : > { %s58_s19 = ssub.s32 %s56_s7, %s1184_s9  ;;  %p1270_p11 = pnand %p1442_p8, %p70_p1 }
  0x48   : > { %p59_p6 = scmp.eq.s32.totalorder %s58_s19, 0  ;;  %p1444_p5 = pmov %p1442_p8 }
  0x49   : > { %s810_s22 = scalar_select %p70_p1, [#allocation3], [#allocation10] }
  0x4a   : > { %s1275_s12 = scalar_select %p59_p6, %s1059_s24, %s61_s17  }
  0x4b   : > { %s811_s15 = scalar_select %p70_p1, %s1075_s27, 0 }
  0x4c   : > { %s1460_s22 = smov (!%p1444_p5, %s810_s22), [#allocation11]  ;;  %p1445_p7 = pmov %p1444_p5 }
  0x4d   : > { %s149_s18 = scalar_lea.vmem [#allocation7], %s635_s21  ;;  %s1289_s17 = scalar_lea.sflag [#allocation8], %s145_s13 }
  0x4e   : > { %s1462_s15 = smov (!%p1445_p7, %s811_s15), 0  ;;  %s157_s9 = sshll.u32 %s149_s18, 4  ;;  %s1282_s9 = int_to_ptr.vmem [resolvable:$true] %s157_s9 }
  0x4f   : > { %s150_s16 = sld [smem:[%s1460_s22 + %s1462_s15]]  ;;  %p951_p0 = pneg %p1270_p11 }
  0x50   : > { %s954_s29 = scalar_lea.hbm %s1420_s2, 3072 }
  0x55   : > { %s680_s7 = sshll.u32 %s150_s16, 10 }
  0x56   : > { %s1287_s4 = scalar_lea.hbm %s1420_s2, %s680_s7 }
  0x57   : > { %s949_s1 = scalar_lea.hbm %s1287_s4, 1024  ;;  %p955_p3 = scmp.lt.u32.totalorder %s1287_s4, %s1420_s2 }
  0x58   : > { %p950_p12 = scmp.ne.s32.totalorder %s1287_s4, %s949_s1  ;;  %p956_p1 = scmp.lt.u32.totalorder %s954_s29, %s949_s1 }
  0x59   : > { %p958_p8 = scmp.lt.u32.totalorder %s949_s1, %s1287_s4 }
  0x5a   : > { %p952_p2 = pnand %p951_p0, %p950_p12  ;;  %p957_p6 = por %p956_p1, %p955_p3 }
  0x5c   : > { %p953_p4 = pneg %p952_p2  ;;  %p959_p5 = por %p958_p8, %p957_p6 }
  0x5e   : > { %p960_p7 = pnand %p959_p5, %p953_p4 }
  0x60   : > { %963 = shalt.err (!%p960_p7)
}
  0x61   : > { %s964_s13 = scalar_lea.vmem %s1282_s9, 1024  ;;  %s1081_s18 = smov [#allocation7]  }
  0x62   : > { %p965_p12 = scmp.ne.s32.totalorder %s1282_s9, %s964_s13  ;;  %s969_s7 = sshll.u32 %s1081_s18, 4  ;;  %s970_s7 = int_to_ptr.vmem [resolvable:$false] %s969_s7 }
  0x63   : > { %s971_s19 = scalar_lea.vmem %s970_s7, 2048  ;;  %p972_p9 = scmp.lt.s32.totalorder %s1282_s9, %s970_s7 }
  0x64   : > { %p967_p2 = pnand %p965_p12, %p951_p0  ;;  %p973_p3 = scmp.lt.s32.totalorder %s971_s19, %s964_s13 }
  0x66   : > { %p968_p10 = pneg %p967_p2  ;;  %p974_p1 = por %p973_p3, %p972_p9 }
  0x68   : > { %p975_p6 = pnand %p974_p1, %p968_p10 }
  0x6a   : > { %978 = shalt.err (!%p975_p6)
}
  0x6b   : > { %s1446_s1 = smov 4   ;;  %s1447_s21 = smov 64  }
  0x6c   : > { %825 = dma.hbm_to_vmem [thread:$0]  (!%p1270_p11), %s1287_s4, 1024, %s1282_s9, %s1289_s17, %s1447_s21, %s1447_s21, %s1446_s1  }
  0x6d   : > { %169 = sbr.rel (%p1248_p13) target bundleno = 394 (0x18a), region = 28  ;;  %s1323_s22 = sand.u32 (!%p1248_p13), 1, %s1067_s26  }
  0x6e   : > { %s639_s29 = sshll.u32 (!%p1248_p13), %s1323_s22, 6  ;;  %s172_s15 = scalar_lea.sflag (!%p1248_p13), [#allocation5], %s1323_s22 }
  0x6f   : > { %s1329_s14 = scalar_lea.vmem (!%p1248_p13), [#allocation4], %s639_s29  ;;  %p1448_p9 = scmp.ne.s32.totalorder (!%p1248_p13), %s1432_s8, 0 }
  0x74   : > { %1038 = dma.done.wait (%p1448_p9), %s172_s15, 1024  }
  0x75   : > { %1040 = vsyncadd (%p1448_p9), %s172_s15, 4294966272  ;;  %s180_s4 = sand.u32 1, %s1055_s23   ;;  %p1449_p13 = scmp.ne.s32.totalorder %s1440_s20, 0 }
  0x76   : > { %s640_s5 = sshll.u32 %s180_s4, 6  ;;  %s181_s9 = scalar_lea.sflag [#allocation8], %s180_s4 }
  0x77   : > { %s1336_s17 = scalar_lea.vmem [#allocation7], %s640_s5 }
  0x78   : > { %1042 = dma.done.wait (%p1449_p13), %s181_s9, 1024  }
  0x79   : > { %1044 = vsyncadd (%p1449_p13), %s181_s9, 4294966272  ;;  %v893_v0 = vld [vmem:[%s1336_s17] sm:$0xff]   ;;  %v894_v1 = vld [vmem:[%s1336_s17 + $0x8] sm:$0xff]   ;;  %s209_s8 = scalar_lea.vmem [#allocation9], %s639_s29  ;;  %s697_s16 = sshll.u32 %s1153_s28, 10 }
  0x7a   : > { %761 = vmatprep.subr.bf16.mxu0 %v893_v0  ;;  %793 = vmatprep.subr.bf16.mxu1 %v893_v0  ;;  %v895_v2 = vld [vmem:[%s1336_s17 + $0x10] sm:$0xff]   ;;  %v896_v3 = vld [vmem:[%s1336_s17 + $0x18] sm:$0xff]   ;;  %v901_v4 = vld [vmem:[%s1329_s14] sm:$0xff]   ;;  %s533_s20 = sshll.u32 %s209_s8, 4  ;;  %s1366_s7 = scalar_lea.hbm %s1421_s3, %s697_s16  ;;  %s1361_s20 = int_to_ptr.vmem [resolvable:$true] %s533_s20 }
  0x7b   : > { %762 = vmatpush3.bf16.msra.mxu0 %v893_v0  ;;  %801 = vmatpush3.bf16.msra.mxu1 %v893_v0  ;;  %v902_v5 = vld [vmem:[%s1329_s14 + $0x20] sm:$0xff]   ;;  %v898_v7 = vld [vmem:[%s1336_s17 + $0x28] sm:$0xff]   ;;  %v899_v8 = vld [vmem:[%s1336_s17 + $0x30] sm:$0xff]   ;;  %s520_s28 = scalar_lea.sflag [#allocation6], %s1323_s22  ;;  %s979_s19 = scalar_lea.vmem %s1361_s20, 1024 }
  0x7c   : > { %763 = vmatprep.subr.bf16.mxu0 %v894_v1  ;;  %794 = vmatprep.subr.bf16.mxu1 %v894_v1  ;;  %v897_v6 = vld [vmem:[%s1336_s17 + $0x20] sm:$0xff]   ;;  %v900_v9 = vld [vmem:[%s1336_s17 + $0x38] sm:$0xff]   ;;  %v903_v10 = vld [vmem:[%s1329_s14 + $0x8] sm:$0xff]   ;;  %p980_p10 = scmp.ne.s32.totalorder %s1361_s20, %s979_s19  ;;  %p1450_p11 = scmp.ne.s32.totalorder %s1433_s10, 0 }
  0x7d   : > { %777 = vmatprep.mubr.bf16.mxu0 %v901_v4  ;;  %785 = vmatprep.mubr.bf16.mxu1 %v902_v5  ;;  %v904_v11 = vld [vmem:[%s1329_s14 + $0x28] sm:$0xff]   ;;  %v905_v12 = vld [vmem:[%s1329_s14 + $0x10] sm:$0xff]   ;;  %v907_v14 = vld [vmem:[%s1329_s14 + $0x18] sm:$0xff]   ;;  %s1082_s1 = smov [#allocation9]  }
  0x7e   : > { %v906_v13 = vld [vmem:[%s1329_s14 + $0x30] sm:$0xff]   ;;  %v908_v15 = vld [vmem:[%s1329_s14 + $0x38] sm:$0xff]   ;;  %p981_p0 = pnand %p980_p10, %p1450_p11  ;;  %s983_s21 = sshll.u32 %s1082_s1, 4  ;;  %s984_s21 = int_to_ptr.vmem [resolvable:$false] %s983_s21 }
  0x7f   : > { %764 = vmatpush3.bf16.msra.mxu0 %v894_v1  ;;  %802 = vmatpush3.bf16.msra.mxu1 %v894_v1  ;;  %s985_s29 = scalar_lea.vmem %s984_s21, 2048  ;;  %p986_p8 = scmp.lt.s32.totalorder %s1361_s20, %s984_s21 }
  0x80   : > { %765 = vmatprep.subr.bf16.mxu0 %v895_v2  ;;  %795 = vmatprep.subr.bf16.mxu1 %v895_v2  ;;  %p982_p4 = pneg %p981_p0  ;;  %p987_p5 = scmp.lt.s32.totalorder %s985_s29, %s979_s19 }
  0x82   : > { %p988_p7 = por %p987_p5, %p986_p8 }
  0x83   : > { %766 = vmatpush3.bf16.msra.mxu0 %v895_v2  ;;  %803 = vmatpush3.bf16.msra.mxu1 %v895_v2 }
  0x84   : > { %767 = vmatprep.subr.bf16.mxu0 %v896_v3  ;;  %796 = vmatprep.subr.bf16.mxu1 %v896_v3  ;;  %p989_p12 = pnand %p988_p7, %p982_p4 }
  0x87   : > { %768 = vmatpush3.bf16.msra.mxu0 %v896_v3  ;;  %804 = vmatpush3.bf16.msra.mxu1 %v896_v3 }
  0x88   : > { %769 = vmatprep.subr.bf16.mxu0 %v897_v6  ;;  %797 = vmatprep.subr.bf16.mxu1 %v897_v6 }
  0x8b   : > { %770 = vmatpush3.bf16.msra.mxu0 %v897_v6  ;;  %805 = vmatpush3.bf16.msra.mxu1 %v897_v6 }
  0x8c   : > { %771 = vmatprep.subr.bf16.mxu0 %v898_v7  ;;  %798 = vmatprep.subr.bf16.mxu1 %v898_v7 }
  0x8f   : > { %772 = vmatpush3.bf16.msra.mxu0 %v898_v7  ;;  %806 = vmatpush3.bf16.msra.mxu1 %v898_v7 }
  0x90   : > { %773 = vmatprep.subr.bf16.mxu0 %v899_v8  ;;  %799 = vmatprep.subr.bf16.mxu1 %v899_v8 }
  0x93   : > { %774 = vmatpush3.bf16.msra.mxu0 %v899_v8  ;;  %807 = vmatpush3.bf16.msra.mxu1 %v899_v8 }
  0x94   : > { %775 = vmatprep.subr.bf16.mxu0 %v900_v9  ;;  %800 = vmatprep.subr.bf16.mxu1 %v900_v9 }
  0x97   : > { %776 = vmatpush3.bf16.msra.mxu0 %v900_v9  ;;  %808 = vmatpush3.bf16.msra.mxu1 %v900_v9 }
  0x9a   : > { %778 = vmatmul.mubr.bf16.vlgmr.msra.gmra.mrb[0].mxu0 %v903_v10  ;;  %786 = vmatmul.mubr.bf16.vlgmr.msra.gmra.mrb[0].mxu1 %v904_v11 }
  0x9b   : > { %781 = vmatprep.mubr.bf16.mxu0 %v905_v12  ;;  %789 = vmatprep.mubr.bf16.mxu1 %v906_v13 }
  0xa2   : > { %782 = vmatmul.mubr.bf16.gmra.mrb[4].mxu0 %v907_v14  ;;  %790 = vmatmul.mubr.bf16.gmra.mrb[4].mxu1 %v908_v15 }
 0x16d   : > { %v779_v16 = vpop.f32.mrb[0].mxu0  ;;  %v787_v17 = vpop.f32.mrb[0].mxu1 }
 0x16e   : > { %v376_v18 = vpop.f32.mrb[1].mxu0  ;;  %v408_v19 = vpop.f32.mrb[1].mxu1 }
 0x16f   : > { %v780_v20 = vpop.f32.mrb[2].mxu0  ;;  %v788_v21 = vpop.f32.mrb[2].mxu1 }
 0x170   : > { %v706_v22 = vpack.c.bf16 %v780_v20, %v779_v16  ;;  %v726_v23 = vpack.c.bf16 %v788_v21, %v787_v17  ;;  %v379_v24 = vpop.f32.mrb[3].mxu0  ;;  %v411_v25 = vpop.f32.mrb[3].mxu1 }
 0x171   : > { %v701_v26 = vpack.c.bf16 %v379_v24, %v376_v18  ;;  %v721_v27 = vpack.c.bf16 %v411_v25, %v408_v19 }
 0x172   : > { %738 = vst [vmem:[%s209_s8 + $0x8] sm:$0xff] %v706_v22   ;;  %742 = vst [vmem:[%s209_s8 + $0x28] sm:$0xff] %v726_v23  }
 0x173   : > { %702 = vst [vmem:[%s209_s8] sm:$0xff] %v701_v26   ;;  %741 = vst [vmem:[%s209_s8 + $0x20] sm:$0xff] %v721_v27  }
 0x175   : > { %v783_v28 = vpop.f32.mrb[4].mxu0  ;;  %v791_v29 = vpop.f32.mrb[4].mxu1 }
 0x176   : > { %v392_v30 = vpop.f32.mrb[5].mxu0  ;;  %v424_v31 = vpop.f32.mrb[5].mxu1 }
 0x177   : > { %v784_v32 = vpop.f32.mrb[6].mxu0  ;;  %v792_v33 = vpop.f32.mrb[6].mxu1 }
 0x178   : > { %v716_v34 = vpack.c.bf16 %v784_v32, %v783_v28  ;;  %v736_v35 = vpack.c.bf16 %v792_v33, %v791_v29  ;;  %v395_v36 = vpop.f32.mrb[7].mxu0  ;;  %v427_v37 = vpop.f32.mrb[7].mxu1 }
 0x179   : > { %v711_v38 = vpack.c.bf16 %v395_v36, %v392_v30  ;;  %v731_v39 = vpack.c.bf16 %v427_v37, %v424_v31 }
 0x17a   : > { %740 = vst [vmem:[%s209_s8 + $0x18] sm:$0xff] %v716_v34   ;;  %744 = vst [vmem:[%s209_s8 + $0x38] sm:$0xff] %v736_v35  }
 0x17b   : > { %739 = vst [vmem:[%s209_s8 + $0x10] sm:$0xff] %v711_v38   ;;  %743 = vst [vmem:[%s209_s8 + $0x30] sm:$0xff] %v731_v39  }
 0x17c   : > { %992 = shalt.err (!%p989_p12)
}
 0x17d   : > { %s993_s15 = scalar_lea.hbm %s1366_s7, 1024  ;;  %s997_s5 = scalar_lea.hbm %s1421_s3, 3072 }
 0x17e   : > { %p994_p2 = scmp.ne.s32.totalorder %s1366_s7, %s993_s15  ;;  %p998_p6 = scmp.lt.u32.totalorder %s1366_s7, %s1421_s3 }
 0x17f   : > { %p999_p9 = scmp.lt.u32.totalorder %s997_s5, %s993_s15  ;;  %p1001_p10 = scmp.lt.u32.totalorder %s993_s15, %s1366_s7 }
 0x180   : > { %p995_p3 = pnand %p994_p2, %p1450_p11 }
 0x181   : > { %p1000_p13 = por %p999_p9, %p998_p6 }
 0x182   : > { %p996_p1 = pneg %p995_p3 }
 0x183   : > { %p1002_p0 = por %p1001_p10, %p1000_p13 }
 0x185   : > { %p1003_p4 = pnand %p1002_p0, %p996_p1 }
 0x187   : > { %1006 = shalt.err (!%p1003_p4)
}
 0x188   : > { %s1083_s8 = smov 64   ;;  %s1084_s16 = smov 4  }
 0x189   : > { %815 = dma.vmem_to_hbm [thread:$0]  (%p1450_p11), %s1361_s20, 1024, %s1366_s7, %s520_s28, %s1083_s8, %s1083_s8, %s1084_s16  }
 0x18a PF: > { %p831_p8 = scmp.ge.s32.totalorder %s1075_s27, 2  ;;  %s548_s13 = sand.u32 1, %s1063_s25  }
 0x18b   : > { %p1451_p5 = scmp.ne.s32.totalorder %s1434_s11, 0  ;;  %s549_s18 = scalar_lea.sflag [#allocation6], %s548_s13 }
 0x18d   : > { %p827_p7 = pnand %p831_p8, %p1451_p5 }
 0x18f   : > { %1046 = dma.done.wait (!%p827_p7), %s549_s18, 1024  }
 0x190   : > { %1048 = vsyncadd (!%p827_p7), %s549_s18, 4294966272  ;;  %p23_p11 = scmp.ge.s32.totalorder %s1157_s30, 5   ;;  %s1452_s22 = smov %s1055_s23 }
 0x191   : > { %s1453_s23 = smov %s1059_s24  ;;  %s1454_s24 = smov %s1275_s12 }
 0x192   : > { %s1455_s25 = smov %s1067_s26  ;;  %s1456_s26 = smov %s1071_s0 }
 0x193   : > { %s1457_s0 = smov %s1169_s6  ;;  %s1458_s27 = smov %s1157_s30 }
 0x194   :  { %25 = sbr.rel (!%p23_p11) target bundleno = 21 (0x15), region = 86 }
 0x19b   :  { %554 = vsyncpa [#allocation5], 1 }
 0x19c   :  { %556 = vsyncpa [#allocation5 + $0x1], 1 }
 0x19d   :  { %557 = vsyncpa [#allocation8], 1 }
 0x19e   :  { %559 = vsyncpa [#allocation8 + $0x1], 1 }
 0x19f   :  { %560 = vsyncpa [#allocation6], 1 }
 0x1a0   :  { %562 = vsyncpa [#allocation6 + $0x1], 1 }

</bundles_post_ra>
